<compile_context>
chip_gen: v7x
topology: tpu7x:2x2x1
jax: 0.10.0
libtpu: 0.0.40
codegen_flags: <defaults>
</compile_context>

<pallas_src>
import jax
import jax.numpy as jnp
from jax.experimental import pallas as pl
from jax.experimental.pallas import tpu as pltpu


# ---------------------------------------------------------------------------
# Kernel
# ---------------------------------------------------------------------------
def _bc_kernel(x_ref, w1_ref, b1_ref, w2_ref, b2_ref, w3_ref, b3_ref, out_ref):
    """Fused 3-layer MLP on one batch tile.

    x_ref : (tb_g, fold*D)   compute dtype (bf16 by default)
    w*_ref: block-diagonal replicated weights, compute dtype
    b*_ref: (1, fold*out)    f32 (bias add / ReLU done in f32)
    out   : (tb_g, fold*A)   f32
    """
    h = jnp.dot(x_ref[...], w1_ref[...], preferred_element_type=jnp.float32)
    h = jnp.maximum(h + b1_ref[...], 0.0)

    h = jnp.dot(h.astype(w2_ref.dtype), w2_ref[...],
                preferred_element_type=jnp.float32)
    h = jnp.maximum(h + b2_ref[...], 0.0)

    mu = jnp.dot(h.astype(w3_ref.dtype), w3_ref[...],
                 preferred_element_type=jnp.float32)
    out_ref[...] = (mu + b3_ref[...]).astype(out_ref.dtype)


# ---------------------------------------------------------------------------
# Wrapper
# ---------------------------------------------------------------------------
def _round_up(v, m):
    return ((v + m - 1) // m) * m


def _fold_params(params, fold, compute_dtype):
    """Build block-diagonal replicated weights + tiled biases for the fold trick."""
    folded = {}
    for i in (1, 2, 3):
        w = params[f"w{i}"]                       # [in, out]
        b = params[f"b{i}"]                       # [1, out]
        eye = jnp.eye(fold, dtype=w.dtype)
        folded[f"w{i}"] = jnp.kron(eye, w).astype(compute_dtype)   # [fold*in, fold*out]
        folded[f"b{i}"] = jnp.tile(b, (1, fold)).astype(jnp.float32)
    return folded


def bc_forward(x, params, *, tile_b=8192, fold=16,
               compute_dtype=jnp.bfloat16, xla_fallback_batch=64):
    """x: [B, num_state] -> mu: [B, num_action] (float32)."""
    B, D = x.shape
    H = params["w1"].shape[1]
    A = params["w3"].shape[1]

    # Tiny batch: the pallas_call fixed cost + one DMA round-trip dominates; a
    # plain XLA fusion of the 3-layer MLP is as fast or faster.
    if B <= xla_fallback_batch:
        return _reference_forward(x, params)

    fp = _fold_params(params, fold, compute_dtype)

    # Pad batch to a multiple of `fold`, then pack `fold` samples per row.
    # (Zero padding only flows through matmul/add/relu -> finite, then dropped.)
    B_pad = _round_up(B, fold)
    if B_pad != B:
        x = jnp.pad(x, ((0, B_pad - B), (0, 0)))
    Bg = B_pad // fold
    Dg, Hg, Ag = fold * D, fold * H, fold * A
    xg = x.reshape(Bg, Dg).astype(compute_dtype)

    # Batch tile in group rows (each group row = `fold` samples).
    tile_g = max(8, _round_up(max(tile_b // fold, 1), 8))
    if Bg <= tile_g:
        if Bg > 8:
            # Split into >=2 multiple-of-8 tiles so v7x's 2nd TC is not idle.
            tb_g = _round_up(pl.cdiv(Bg, 2), 8)
        else:
            tb_g = Bg                              # full dim -> legal block shape
    else:
        tb_g = tile_g                              # multiple of 8
    grid = (pl.cdiv(Bg, tb_g),)

    act_spec = pl.BlockSpec((tb_g, Dg), lambda i: (i, 0))
    out_spec = pl.BlockSpec((tb_g, Ag), lambda i: (i, 0))

    def const_spec(arr):
        # Resident across the whole grid: block index never changes.
        return pl.BlockSpec(arr.shape, lambda i: (0, 0))

    # Advisory cost for XLA's scheduler (useful flops; bf16 operand bytes).
    flops = 2 * B_pad * (D * H + H * H + H * A)
    bytes_accessed = (
        2 * B_pad * D                                            # x (bf16)
        + 2 * (Dg * Hg + Hg * Hg + Hg * Ag)                      # folded weights (bf16)
        + 4 * (Hg + Hg + Ag)                                     # biases (f32)
        + 4 * B_pad * A                                          # output (f32)
    )
    cost = pl.CostEstimate(flops=flops, transcendentals=0,
                           bytes_accessed=bytes_accessed)

    out = pl.pallas_call(
        _bc_kernel,
        out_shape=jax.ShapeDtypeStruct((Bg, Ag), jnp.float32),
        grid_spec=pltpu.PrefetchScalarGridSpec(
            num_scalar_prefetch=0,
            grid=grid,
            in_specs=[
                act_spec,
                const_spec(fp["w1"]), const_spec(fp["b1"]),
                const_spec(fp["w2"]), const_spec(fp["b2"]),
                const_spec(fp["w3"]), const_spec(fp["b3"]),
            ],
            out_specs=out_spec,
        ),
        compiler_params=pltpu.CompilerParams(
            dimension_semantics=("parallel",),     # shard batch tiles across TCs (v7x)
        ),
        cost_estimate=cost,
    )(xg, fp["w1"], fp["b1"], fp["w2"], fp["b2"], fp["w3"], fp["b3"])

    mu = out.reshape(B_pad, A)
    return mu[:B] if B_pad != B else mu


# ---------------------------------------------------------------------------
# Params / reference
# ---------------------------------------------------------------------------
def init_bc_params(key, num_state, num_action, num_hidden):
    """PyTorch nn.Linear default init: U[-1/sqrt(fan_in), +1/sqrt(fan_in)].
    Weights stored transposed as [in_features, out_features]."""
    dims = [
        (num_state, num_hidden),   # fc1
        (num_hidden, num_hidden),  # fc2
        (num_hidden, num_action),  # mu_head
    ]
    params = {}
    keys = jax.random.split(key, 2 * len(dims))
    for i, (fan_in, fan_out) in enumerate(dims):
        bound = 1.0 / jnp.sqrt(fan_in)
        params[f"w{i + 1}"] = jax.random.uniform(
            keys[2 * i], (fan_in, fan_out), jnp.float32, -bound, bound
        )
        params[f"b{i + 1}"] = jax.random.uniform(
            keys[2 * i + 1], (1, fan_out), jnp.float32, -bound, bound
        )
    return params


def _reference_forward(x, params):
    """Pure-JAX (f32) reference matching the PyTorch BC.forward semantics."""
    h = jax.nn.relu(x @ params["w1"] + params["b1"])
    h = jax.nn.relu(h @ params["w2"] + params["b2"])
    return h @ params["w3"] + params["b3"]


# ---------------------------------------------------------------------------
# Test
# ---------------------------------------------------------------------------
if __name__ == "__main__":
    num_state, num_action, num_hidden = 16, 8, 32

    key = jax.random.PRNGKey(0)
    k_params, k1, k2, k3, k4 = jax.random.split(key, 5)
    params = init_bc_params(k_params, num_state, num_action, num_hidden)

    # 1) Tiny batch, Pallas path forced (single tile). bf16 compute -> loose tol.
    x1 = jax.random.normal(k1, (2, num_state), jnp.float32)
    mu1 = bc_forward(x1, params, xla_fallback_batch=0)
    jax.block_until_ready(mu1)
    ref1 = _reference_forward(x1, params)
    assert mu1.shape == (2, num_action)
    assert jnp.allclose(mu1, ref1, atol=5e-2, rtol=5e-2), "mismatch (small batch, bf16)"

    # 2) Multi-tile grid with batch padding (B=300 not a multiple of fold=16).
    x2 = jax.random.normal(k2, (300, num_state), jnp.float32)
    mu2 = bc_forward(x2, params, tile_b=128, xla_fallback_batch=0)
    jax.block_until_ready(mu2)
    ref2 = _reference_forward(x2, params)
    assert mu2.shape == (300, num_action)
    assert jnp.allclose(mu2, ref2, atol=5e-2, rtol=5e-2), "mismatch (gridded batch, bf16)"

    # 3) f32 compute path, batch split into 2 tiles (v7x megacore split path).
    x3 = jax.random.normal(k3, (512, num_state), jnp.float32)
    mu3 = bc_forward(x3, params, compute_dtype=jnp.float32, xla_fallback_batch=0)
    jax.block_until_ready(mu3)
    ref3 = _reference_forward(x3, params)
    assert mu3.shape == (512, num_action)
    assert jnp.allclose(mu3, ref3, atol=5e-3, rtol=5e-3), "mismatch (two-tile, f32)"

    # 4) Default dispatch: tiny batch takes the plain-XLA fused path.
    x4 = jax.random.normal(k4, (32, num_state), jnp.float32)
    mu4 = bc_forward(x4, params)
    jax.block_until_ready(mu4)
    assert mu4.shape == (32, num_action)
    assert jnp.allclose(mu4, _reference_forward(x4, params), atol=1e-6), "mismatch (XLA fallback)"

    print("KERNEL_OK")
</pallas_src>

<mosaic_0001>
module attributes {stable_mosaic.version = 11 : i64} {
  func.func @_bc_kernel(%arg0: i32, %arg1: memref<1x256xbf16, #tpu.memory_space<vmem>>, %arg2: memref<256x512xbf16, #tpu.memory_space<vmem>>, %arg3: memref<1x512xf32, #tpu.memory_space<vmem>>, %arg4: memref<512x512xbf16, #tpu.memory_space<vmem>>, %arg5: memref<1x512xf32, #tpu.memory_space<vmem>>, %arg6: memref<512x128xbf16, #tpu.memory_space<vmem>>, %arg7: memref<1x128xf32, #tpu.memory_space<vmem>>, %arg8: memref<1x128xf32, #tpu.memory_space<vmem>>) attributes {dimension_semantics = [#tpu.dimension_semantics<parallel>], iteration_bounds = array<i64: 1>, scalar_prefetch = 0 : i64, scratch_operands = 0 : i64, tpu.core_type = #tpu.core_type<tc>, window_params = [{transform_indices = @transform_0, window_bounds = array<i64: 1, 256>}, {pipeline_mode = #tpu.pipeline_mode<synchronous>, transform_indices = @transform_1, window_bounds = array<i64: 256, 512>}, {pipeline_mode = #tpu.pipeline_mode<synchronous>, transform_indices = @transform_2, window_bounds = array<i64: 1, 512>}, {pipeline_mode = #tpu.pipeline_mode<synchronous>, transform_indices = @transform_3, window_bounds = array<i64: 512, 512>}, {pipeline_mode = #tpu.pipeline_mode<synchronous>, transform_indices = @transform_4, window_bounds = array<i64: 1, 512>}, {pipeline_mode = #tpu.pipeline_mode<synchronous>, transform_indices = @transform_5, window_bounds = array<i64: 512, 128>}, {pipeline_mode = #tpu.pipeline_mode<synchronous>, transform_indices = @transform_6, window_bounds = array<i64: 1, 128>}, {transform_indices = @transform_7, window_bounds = array<i64: 1, 128>}]} {
    %c0 = arith.constant 0 : index
    %c0_0 = arith.constant 0 : index
    %0 = vector.load %arg1[%c0, %c0_0] : memref<1x256xbf16, #tpu.memory_space<vmem>>, vector<1x256xbf16>
    %c0_1 = arith.constant 0 : index
    %c0_2 = arith.constant 0 : index
    %1 = vector.load %arg2[%c0_1, %c0_2] : memref<256x512xbf16, #tpu.memory_space<vmem>>, vector<256x512xbf16>
    %cst = arith.constant dense<0.000000e+00> : vector<1x512xf32>
    %2 = tpu.matmul %0, %1, %cst {dimension_numbers = #tpu.dot_dimension_numbers<[1], [0], [0], [1], [0, 0, 1, 1], [], []>} : vector<1x256xbf16>, vector<256x512xbf16>, vector<1x512xf32> -> vector<1x512xf32>
    %c0_3 = arith.constant 0 : index
    %c0_4 = arith.constant 0 : index
    %3 = vector.load %arg3[%c0_3, %c0_4] : memref<1x512xf32, #tpu.memory_space<vmem>>, vector<1x512xf32>
    %4 = arith.addf %2, %3 : vector<1x512xf32>
    %cst_5 = arith.constant 0.000000e+00 : f32
    %5 = vector.broadcast %cst_5 : f32 to vector<1x512xf32>
    %6 = arith.maximumf %4, %5 : vector<1x512xf32>
    %7 = arith.truncf %6 : vector<1x512xf32> to vector<1x512xbf16>
    %c0_6 = arith.constant 0 : index
    %c0_7 = arith.constant 0 : index
    %8 = vector.load %arg4[%c0_6, %c0_7] : memref<512x512xbf16, #tpu.memory_space<vmem>>, vector<512x512xbf16>
    %cst_8 = arith.constant dense<0.000000e+00> : vector<1x512xf32>
    %9 = tpu.matmul %7, %8, %cst_8 {dimension_numbers = #tpu.dot_dimension_numbers<[1], [0], [0], [1], [0, 0, 1, 1], [], []>} : vector<1x512xbf16>, vector<512x512xbf16>, vector<1x512xf32> -> vector<1x512xf32>
    %c0_9 = arith.constant 0 : index
    %c0_10 = arith.constant 0 : index
    %10 = vector.load %arg5[%c0_9, %c0_10] : memref<1x512xf32, #tpu.memory_space<vmem>>, vector<1x512xf32>
    %11 = arith.addf %9, %10 : vector<1x512xf32>
    %cst_11 = arith.constant 0.000000e+00 : f32
    %12 = vector.broadcast %cst_11 : f32 to vector<1x512xf32>
    %13 = arith.maximumf %11, %12 : vector<1x512xf32>
    %14 = arith.truncf %13 : vector<1x512xf32> to vector<1x512xbf16>
    %c0_12 = arith.constant 0 : index
    %c0_13 = arith.constant 0 : index
    %15 = vector.load %arg6[%c0_12, %c0_13] : memref<512x128xbf16, #tpu.memory_space<vmem>>, vector<512x128xbf16>
    %cst_14 = arith.constant dense<0.000000e+00> : vector<1x128xf32>
    %16 = tpu.matmul %14, %15, %cst_14 {dimension_numbers = #tpu.dot_dimension_numbers<[1], [0], [0], [1], [0, 0, 1, 1], [], []>} : vector<1x512xbf16>, vector<512x128xbf16>, vector<1x128xf32> -> vector<1x128xf32>
    %c0_15 = arith.constant 0 : index
    %c0_16 = arith.constant 0 : index
    %17 = vector.load %arg7[%c0_15, %c0_16] : memref<1x128xf32, #tpu.memory_space<vmem>>, vector<1x128xf32>
    %18 = arith.addf %16, %17 : vector<1x128xf32>
    %c0_17 = arith.constant 0 : index
    %c0_18 = arith.constant 0 : index
    %19 = vector.load %arg8[%c0_17, %c0_18] : memref<1x128xf32, #tpu.memory_space<vmem>>, vector<1x128xf32>
    tpu.vector_store %arg8[%c0_17, %c0_18], %18 {strides = array<i32>} : memref<1x128xf32, #tpu.memory_space<vmem>>, vector<1x128xf32>,
    return
  }
  func.func @transform_0(%arg0: i32) -> (i32, i32) {
    %c0_i32 = arith.constant 0 : i32
    %c0_i32_0 = arith.constant 0 : i32
    return %arg0, %c0_i32 : i32, i32
  }
  func.func @transform_1(%arg0: i32) -> (i32, i32) {
    %c0_i32 = arith.constant 0 : i32
    %c0_i32_0 = arith.constant 0 : i32
    %c0_i32_1 = arith.constant 0 : i32
    return %c0_i32, %c0_i32_0 : i32, i32
  }
  func.func @transform_2(%arg0: i32) -> (i32, i32) {
    %c0_i32 = arith.constant 0 : i32
    %c0_i32_0 = arith.constant 0 : i32
    %c0_i32_1 = arith.constant 0 : i32
    return %c0_i32, %c0_i32_0 : i32, i32
  }
  func.func @transform_3(%arg0: i32) -> (i32, i32) {
    %c0_i32 = arith.constant 0 : i32
    %c0_i32_0 = arith.constant 0 : i32
    %c0_i32_1 = arith.constant 0 : i32
    return %c0_i32, %c0_i32_0 : i32, i32
  }
  func.func @transform_4(%arg0: i32) -> (i32, i32) {
    %c0_i32 = arith.constant 0 : i32
    %c0_i32_0 = arith.constant 0 : i32
    %c0_i32_1 = arith.constant 0 : i32
    return %c0_i32, %c0_i32_0 : i32, i32
  }
  func.func @transform_5(%arg0: i32) -> (i32, i32) {
    %c0_i32 = arith.constant 0 : i32
    %c0_i32_0 = arith.constant 0 : i32
    %c0_i32_1 = arith.constant 0 : i32
    return %c0_i32, %c0_i32_0 : i32, i32
  }
  func.func @transform_6(%arg0: i32) -> (i32, i32) {
    %c0_i32 = arith.constant 0 : i32
    %c0_i32_0 = arith.constant 0 : i32
    %c0_i32_1 = arith.constant 0 : i32
    return %c0_i32, %c0_i32_0 : i32, i32
  }
  func.func @transform_7(%arg0: i32) -> (i32, i32) {
    %c0_i32 = arith.constant 0 : i32
    %c0_i32_0 = arith.constant 0 : i32
    return %arg0, %c0_i32 : i32, i32
  }
}

</mosaic_0001>

<bundles_post_ra>
// kernel: tpu_custom_call.1
= control target key start
LH: loop header
LB: loop body
LE: loop exit
PB: predicated region body
PF: predicated region fallthrough
CT: control target
= control target key end

     0   :  { %12 = vsyncpa [#allocation3], 0  ;;  %s2815_s0 = inlined_call_operand.hbm [shape: bf16[1,256], index: 0, kind: input, shape index: {}]   ;;  %s2816_s1 = inlined_call_operand.hbm [shape: bf16[256,512], index: 1, kind: input, shape index: {}]   ;;  %s2817_s2 = inlined_call_operand.vmem [shape: f32[1,512], index: 2, kind: input, shape index: {}]   ;;  %s2818_s3 = inlined_call_operand.hbm [shape: bf16[512,512], index: 3, kind: input, shape index: {}]   ;;  %s2819_s4 = inlined_call_operand.vmem [shape: f32[1,512], index: 4, kind: input, shape index: {}]   ;;  %s2820_s5 = inlined_call_operand.hbm [shape: bf16[512,128], index: 5, kind: input, shape index: {}]   ;;  %s2821_s6 = inlined_call_operand.vmem [shape: f32[1,128], index: 6, kind: input, shape index: {}]   ;;  %s2822_s7 = inlined_call_operand.hbm [shape: f32[1,128], index: 7, kind: output, shape index: {}]  }
   0x1   :  { %13 = vsyncpa [#allocation6], 0 }
   0x2   :  { %14 = vsyncpa [#allocation9], 0 }
   0x3   :  { %15 = vsyncpa [#allocation4], 0  ;;  %s2649_s24 = smov [#allocation5]   ;;  %s2531_s28 = scalar_lea.hbm %s2816_s1, 8192 }
   0x4   :  { %s31_s25 = sshll.u32 %s2649_s24, 4  ;;  %p2532_p0 = scmp.ne.s32.totalorder %s2816_s1, %s2531_s28  ;;  %s32_s25 = int_to_ptr.vmem [resolvable:$true] %s31_s25 }
   0x5   :  { %p2535_p1 = scmp.lt.u32.totalorder %s2531_s28, %s2816_s1 }
   0x7   :  { %p2537_p2 = pnand %p2535_p1, %p2532_p0 }
   0x9   :  { %2540 = shalt.err (!%p2537_p2)
}
   0xa   :  { %s2541_s10 = scalar_lea.vmem %s32_s25, 8192  ;;  %p2546_p4 = scmp.lt.s32.totalorder %s32_s25, %s32_s25 }
   0xb   :  { %p2542_p3 = scmp.ne.s32.totalorder %s32_s25, %s2541_s10  ;;  %p2547_p5 = scmp.lt.s32.totalorder %s2541_s10, %s2541_s10 }
   0xd   :  { %p2548_p6 = por %p2547_p5, %p2546_p4 }
   0xf   :  { %p2549_p7 = pnand %p2548_p6, %p2542_p3 }
  0x11   :  { %2552 = shalt.err (!%p2549_p7)
}
  0x12   :  { %s2650_s11 = smov 256   ;;  %s2651_s12 = smov 16  }
  0x13   :  { %37 = dma.hbm_to_vmem [thread:$0]  %s2816_s1, 8192, %s32_s25, [#allocation6], %s2650_s11, %s2650_s11, %s2651_s12  }
  0x14   :  { %s2652_s15 = smov [#allocation2]   ;;  %s2653_s17 = smov [#allocation7]  }
  0x15   :  { %s22_s16 = sshll.u32 %s2652_s15, 4  ;;  %s45_s18 = sshll.u32 %s2653_s17, 4  ;;  %s23_s16 = int_to_ptr.vmem [resolvable:$true] %s22_s16  ;;  %s46_s18 = int_to_ptr.vmem [resolvable:$true] %s45_s18 }
  0x16   :  { %s2553_s21 = scalar_lea.hbm %s2815_s0, 32 }
  0x17   :  { %p2554_p8 = scmp.ne.s32.totalorder %s2815_s0, %s2553_s21  ;;  %p2557_p9 = scmp.lt.u32.totalorder %s2553_s21, %s2815_s0 }
  0x19   :  { %p2559_p10 = pnand %p2557_p9, %p2554_p8 }
  0x1b   :  { %2562 = shalt.err (!%p2559_p10)
}
  0x1c   :  { %s2563_s1 = scalar_lea.vmem %s23_s16, 32  ;;  %p2568_p12 = scmp.lt.s32.totalorder %s23_s16, %s23_s16 }
  0x1d   :  { %p2564_p11 = scmp.ne.s32.totalorder %s23_s16, %s2563_s1  ;;  %p2569_p13 = scmp.lt.s32.totalorder %s2563_s1, %s2563_s1 }
  0x1f   :  { %p2570_p0 = por %p2569_p13, %p2568_p12 }
  0x21   :  { %p2571_p1 = pnand %p2570_p0, %p2564_p11 }
  0x23   :  { %2574 = shalt.err (!%p2571_p1)
}
  0x24   :  { %25 = dma.hbm_to_vmem [thread:$0]  %s2815_s0, 32, %s23_s16, [#allocation3]  }
  0x25   :  { %s2575_s30 = scalar_lea.hbm %s2818_s3, 16384 }
  0x26   :  { %p2576_p2 = scmp.ne.s32.totalorder %s2818_s3, %s2575_s30  ;;  %p2579_p3 = scmp.lt.u32.totalorder %s2575_s30, %s2818_s3 }
  0x28   :  { %p2581_p4 = pnand %p2579_p3, %p2576_p2 }
  0x2a   :  { %2584 = shalt.err (!%p2581_p4)
}
  0x2b   :  { %s2585_s14 = scalar_lea.vmem %s46_s18, 16384  ;;  %p2590_p6 = scmp.lt.s32.totalorder %s46_s18, %s46_s18 }
  0x2c   :  { %p2586_p5 = scmp.ne.s32.totalorder %s46_s18, %s2585_s14  ;;  %p2591_p7 = scmp.lt.s32.totalorder %s2585_s14, %s2585_s14 }
  0x2e   :  { %p2592_p8 = por %p2591_p7, %p2590_p6 }
  0x30   :  { %p2593_p9 = pnand %p2592_p8, %p2586_p5 }
  0x32   :  { %2596 = shalt.err (!%p2593_p9)
}
  0x33   :  { %51 = dma.hbm_to_vmem [thread:$0]  %s2818_s3, 16384, %s46_s18, [#allocation6], %s2650_s11, %s2650_s11, %s2651_s12  }
  0x34   :  { %s2654_s16 = smov [#allocation8]   ;;  %s2597_s21 = scalar_lea.hbm %s2820_s5, 4096 }
  0x35   :  { %s59_s17 = sshll.u32 %s2654_s16, 4  ;;  %p2598_p10 = scmp.ne.s32.totalorder %s2820_s5, %s2597_s21  ;;  %s60_s17 = int_to_ptr.vmem [resolvable:$true] %s59_s17 }
  0x36   :  { %p2601_p11 = scmp.lt.u32.totalorder %s2597_s21, %s2820_s5 }
  0x38   :  { %p2603_p12 = pnand %p2601_p11, %p2598_p10 }
  0x3a   :  { %2606 = shalt.err (!%p2603_p12)
}
  0x3b   :  { %s2607_s1 = scalar_lea.vmem %s60_s17, 4096  ;;  %p2612_p0 = scmp.lt.s32.totalorder %s60_s17, %s60_s17 }
  0x3c   :  { %p2608_p13 = scmp.ne.s32.totalorder %s60_s17, %s2607_s1  ;;  %p2613_p1 = scmp.lt.s32.totalorder %s2607_s1, %s2607_s1 }
  0x3e   :  { %p2614_p2 = por %p2613_p1, %p2612_p0 }
  0x40   :  { %p2615_p3 = pnand %p2614_p2, %p2608_p13 }
  0x42   :  { %2618 = shalt.err (!%p2615_p3)
}
  0x43   :  { %s2655_s3 = smov 64   ;;  %s2656_s11 = smov 4  }
  0x44   :  { %65 = dma.hbm_to_vmem [thread:$0]  %s2820_s5, 4096, %s60_s17, [#allocation9], %s2655_s3, %s2655_s3, %s2656_s11  }
  0x45   :  { %2641 = dma.done.wait [#allocation3], 32  }
  0x46   :  { %2642 = vsyncadd [#allocation3], 4294967264 }
  0x47   :  { %2643 = dma.done.wait [#allocation6], 24576  }
  0x48   :  { %2644 = vsyncadd [#allocation6], 4294942720 }
  0x49   :  { %2645 = dma.done.wait [#allocation9], 4096  }
  0x4a   :  { %2646 = vsyncadd [#allocation9], 4294963200  ;;  %v2211_v0 = vld [vmem:[#allocation5 + $0x4] ss:$16 sps:$4 sm:$0xff]   ;;  %v2213_v1 = vld [vmem:[#allocation5] ss:$16 sps:$4 sm:$0xff]   ;;  %v159_v11 = vlaneseq }
  0x4b   :  { %513 = vmatprep.subr.bf16.mxu0 %v2211_v0  ;;  %v2214_v2 = vld [vmem:[#allocation5 + $0x24] ss:$16 sps:$4 sm:$0xff]   ;;  %v2216_v3 = vld [vmem:[#allocation5 + $0x20] ss:$16 sps:$4 sm:$0xff]   ;;  %v2657_v9 = vmov 1966171168  }
  0x4c   :  { %514 = vmatpush1.bf16.msra.mxu0 %v2213_v1  ;;  %v2217_v4 = vld [vmem:[#allocation5 + $0x44] ss:$16 sps:$4 sm:$0xff]   ;;  %v2219_v5 = vld [vmem:[#allocation5 + $0x40] ss:$16 sps:$4 sm:$0xff]   ;;  %v157_v10 = vunpack.c.l.s4 %v2657_v9  ;;  %v2753_v15 = vshrl.u32 %v159_v11, 7  ;;  %s2658_s29 = smov [#allocation10]  }
  0x4d   :  { %515 = vmatprep.subr.bf16.mxu0 %v2214_v2  ;;  %v2220_v6 = vld [vmem:[#allocation5 + $0x64] ss:$16 sps:$4 sm:$0xff]   ;;  %v2222_v7 = vld [vmem:[#allocation5 + $0x60] ss:$16 sps:$4 sm:$0xff]   ;;  %v2258_v18 = vld [vmem:[#allocation5 + $0xc] ss:$16 sps:$4 sm:$0xff]  }
  0x4e   :  { %v2223_v8 = vld [vmem:[#allocation5 + $0x84] ss:$16 sps:$4 sm:$0xff]   ;;  %v2225_v12 = vld [vmem:[#allocation5 + $0x80] ss:$16 sps:$4 sm:$0xff]   ;;  %v158_v14 = vunpack.c.0.s8 %v157_v10  ;;  %v2261_v20 = vld [vmem:[#allocation5 + $0x8] ss:$16 sps:$4 sm:$0xff]   ;;  %554 = vmatprep.subr.bf16.mxu1 %v2258_v18 }
  0x4f   :  { %v2226_v13 = vld [vmem:[#allocation5 + $0xa4] ss:$16 sps:$4 sm:$0xff]   ;;  %v2228_v16 = vld [vmem:[#allocation5 + $0xa0] ss:$16 sps:$4 sm:$0xff]   ;;  %555 = vmatpush1.bf16.msra.mxu1 %v2261_v20  ;;  %v2262_v25 = vld [vmem:[#allocation5 + $0x2c] ss:$16 sps:$4 sm:$0xff]  }
  0x50   :  { %516 = vmatpush1.bf16.msra.mxu0 %v2216_v3  ;;  %v2229_v17 = vld [vmem:[#allocation5 + $0xc4] ss:$16 sps:$4 sm:$0xff]   ;;  %v2231_v19 = vld [vmem:[#allocation5 + $0xc0] ss:$16 sps:$4 sm:$0xff]   ;;  %v2756_v21 = vsub.s32 %v158_v14, %v2753_v15  ;;  %v2264_v26 = vld [vmem:[#allocation5 + $0x28] ss:$16 sps:$4 sm:$0xff]   ;;  %556 = vmatprep.subr.bf16.mxu1 %v2262_v25 }
  0x51   :  { %517 = vmatprep.subr.bf16.mxu0 %v2217_v4  ;;  %v2758_v22 = vld.sshfl [vmem:[#allocation2] sm:$0x11 pattern:$0x75316420]  ;;  %v2232_v23 = vld [vmem:[#allocation5 + $0xe4] ss:$16 sps:$4 sm:$0xff]  }
  0x52   :  { %v155_v24 = vcombine.high %v2758_v22, %v2758_v22  ;;  %v2265_v28 = vld [vmem:[#allocation5 + $0x4c] ss:$16 sps:$4 sm:$0xff]   ;;  %v2234_v29 = vld [vmem:[#allocation5 + $0xe0] ss:$16 sps:$4 sm:$0xff]   ;;  %v2235_v30 = vld [vmem:[#allocation5 + $0x104] ss:$16 sps:$4 sm:$0xff]   ;;  %v162_v0 = vrot.slane %v2758_v22, %v2756_v21 }
  0x53   :  { %557 = vmatpush1.bf16.msra.mxu1 %v2264_v26  ;;  %v2267_v31 = vld [vmem:[#allocation5 + $0x48] ss:$16 sps:$4 sm:$0xff]   ;;  %v2268_v32 = vld [vmem:[#allocation5 + $0x6c] ss:$16 sps:$4 sm:$0xff]   ;;  %v2237_v33 = vld [vmem:[#allocation5 + $0x100] ss:$16 sps:$4 sm:$0xff]  }
  0x54   :  { %518 = vmatpush1.bf16.msra.mxu0 %v2219_v5  ;;  %v169_v27 = vrot.slane %v155_v24, %v2756_v21  ;;  %558 = vmatprep.subr.bf16.mxu1 %v2265_v28  ;;  %v2238_v34 = vld [vmem:[#allocation5 + $0x124] ss:$16 sps:$4 sm:$0xff]   ;;  %v2270_v35 = vld [vmem:[#allocation5 + $0x68] ss:$16 sps:$4 sm:$0xff]   ;;  %v2271_v36 = vld [vmem:[#allocation5 + $0x8c] ss:$16 sps:$4 sm:$0xff]  }
  0x55   :  { %519 = vmatprep.subr.bf16.mxu0 %v2220_v6  ;;  %v2240_v37 = vld [vmem:[#allocation5 + $0x120] ss:$16 sps:$4 sm:$0xff]   ;;  %v2241_v38 = vld [vmem:[#allocation5 + $0x144] ss:$16 sps:$4 sm:$0xff]   ;;  %v2273_v39 = vld [vmem:[#allocation5 + $0x88] ss:$16 sps:$4 sm:$0xff]  }
  0x56   :  { %545 = vmatprep.mubr.bf16.mxu0 %v169_v27  ;;  %586 = vmatprep.mubr.bf16.mxu1 %v169_v27  ;;  %v2274_v40 = vld [vmem:[#allocation5 + $0xac] ss:$16 sps:$4 sm:$0xff]   ;;  %v2243_v41 = vld [vmem:[#allocation5 + $0x140] ss:$16 sps:$4 sm:$0xff]   ;;  %v2244_v42 = vld [vmem:[#allocation5 + $0x164] ss:$16 sps:$4 sm:$0xff]  }
  0x57   :  { %559 = vmatpush1.bf16.msra.mxu1 %v2267_v31  ;;  %v2276_v43 = vld [vmem:[#allocation5 + $0xa8] ss:$16 sps:$4 sm:$0xff]   ;;  %v2277_v44 = vld [vmem:[#allocation5 + $0xcc] ss:$16 sps:$4 sm:$0xff]   ;;  %v2246_v45 = vld [vmem:[#allocation5 + $0x160] ss:$16 sps:$4 sm:$0xff]  }
  0x58   :  { %520 = vmatpush1.bf16.msra.mxu0 %v2222_v7  ;;  %560 = vmatprep.subr.bf16.mxu1 %v2268_v32  ;;  %v2247_v46 = vld [vmem:[#allocation5 + $0x184] ss:$16 sps:$4 sm:$0xff]   ;;  %v2279_v47 = vld [vmem:[#allocation5 + $0xc8] ss:$16 sps:$4 sm:$0xff]   ;;  %v2280_v48 = vld [vmem:[#allocation5 + $0xec] ss:$16 sps:$4 sm:$0xff]  }
  0x59   :  { %521 = vmatprep.subr.bf16.mxu0 %v2223_v8  ;;  %v2249_v49 = vld [vmem:[#allocation5 + $0x180] ss:$16 sps:$4 sm:$0xff]   ;;  %v2250_v50 = vld [vmem:[#allocation5 + $0x1a4] ss:$16 sps:$4 sm:$0xff]   ;;  %v2282_v51 = vld [vmem:[#allocation5 + $0xe8] ss:$16 sps:$4 sm:$0xff]  }
  0x5a   :  { %v2283_v52 = vld [vmem:[#allocation5 + $0x10c] ss:$16 sps:$4 sm:$0xff]   ;;  %v2252_v53 = vld [vmem:[#allocation5 + $0x1a0] ss:$16 sps:$4 sm:$0xff]   ;;  %v2253_v54 = vld [vmem:[#allocation5 + $0x1c4] ss:$16 sps:$4 sm:$0xff]  }
  0x5b   :  { %561 = vmatpush1.bf16.msra.mxu1 %v2270_v35  ;;  %v2285_v55 = vld [vmem:[#allocation5 + $0x108] ss:$16 sps:$4 sm:$0xff]   ;;  %v2286_v56 = vld [vmem:[#allocation5 + $0x12c] ss:$16 sps:$4 sm:$0xff]   ;;  %v2255_v57 = vld [vmem:[#allocation5 + $0x1c0] ss:$16 sps:$4 sm:$0xff]  }
  0x5c   :  { %522 = vmatpush1.bf16.msra.mxu0 %v2225_v12  ;;  %562 = vmatprep.subr.bf16.mxu1 %v2271_v36  ;;  %v2256_v58 = vld [vmem:[#allocation5 + $0x1e4] ss:$16 sps:$4 sm:$0xff]   ;;  %v2288_v59 = vld [vmem:[#allocation5 + $0x128] ss:$16 sps:$4 sm:$0xff]   ;;  %v2289_v60 = vld [vmem:[#allocation5 + $0x14c] ss:$16 sps:$4 sm:$0xff]  }
  0x5d   :  { %523 = vmatprep.subr.bf16.mxu0 %v2226_v13  ;;  %v2260_v61 = vld [vmem:[#allocation5 + $0x1e0] ss:$16 sps:$4 sm:$0xff]   ;;  %v2309_v62 = vld [vmem:[#allocation7 + $0x4] ss:$16 sps:$4 sm:$0xff]   ;;  %v2291_v63 = vld [vmem:[#allocation5 + $0x148] ss:$16 sps:$4 sm:$0xff]  }
  0x5e   :  { %v2292_v1 = vld [vmem:[#allocation5 + $0x16c] ss:$16 sps:$4 sm:$0xff]   ;;  %v2307_v2 = vld [vmem:[#allocation7] ss:$16 sps:$4 sm:$0xff]   ;;  %v2315_v3 = vld [vmem:[#allocation7 + $0x24] ss:$16 sps:$4 sm:$0xff]  }
  0x5f   :  { %563 = vmatpush1.bf16.msra.mxu1 %v2273_v39  ;;  %v2294_v4 = vld [vmem:[#allocation5 + $0x168] ss:$16 sps:$4 sm:$0xff]   ;;  %v2295_v5 = vld [vmem:[#allocation5 + $0x18c] ss:$16 sps:$4 sm:$0xff]   ;;  %v2313_v6 = vld [vmem:[#allocation7 + $0x20] ss:$16 sps:$4 sm:$0xff]  }
  0x60   :  { %524 = vmatpush1.bf16.msra.mxu0 %v2228_v16  ;;  %564 = vmatprep.subr.bf16.mxu1 %v2274_v40  ;;  %v2321_v7 = vld [vmem:[#allocation7 + $0x44] ss:$16 sps:$4 sm:$0xff]   ;;  %v2297_v8 = vld [vmem:[#allocation5 + $0x188] ss:$16 sps:$4 sm:$0xff]   ;;  %v2298_v9 = vld [vmem:[#allocation5 + $0x1ac] ss:$16 sps:$4 sm:$0xff]  }
  0x61   :  { %525 = vmatprep.subr.bf16.mxu0 %v2229_v17  ;;  %v2319_v10 = vld [vmem:[#allocation7 + $0x40] ss:$16 sps:$4 sm:$0xff]   ;;  %v2327_v11 = vld [vmem:[#allocation7 + $0x64] ss:$16 sps:$4 sm:$0xff]   ;;  %v2300_v12 = vld [vmem:[#allocation5 + $0x1a8] ss:$16 sps:$4 sm:$0xff]  }
  0x62   :  { %v2301_v13 = vld [vmem:[#allocation5 + $0x1cc] ss:$16 sps:$4 sm:$0xff]   ;;  %v2325_v14 = vld [vmem:[#allocation7 + $0x60] ss:$16 sps:$4 sm:$0xff]   ;;  %v2333_v16 = vld [vmem:[#allocation7 + $0x84] ss:$16 sps:$4 sm:$0xff]  }
  0x63   :  { %565 = vmatpush1.bf16.msra.mxu1 %v2276_v43  ;;  %v2303_v17 = vld [vmem:[#allocation5 + $0x1c8] ss:$16 sps:$4 sm:$0xff]   ;;  %v2304_v18 = vld [vmem:[#allocation5 + $0x1ec] ss:$16 sps:$4 sm:$0xff]   ;;  %v2331_v20 = vld [vmem:[#allocation7 + $0x80] ss:$16 sps:$4 sm:$0xff]  }
  0x64   :  { %526 = vmatpush1.bf16.msra.mxu0 %v2231_v19  ;;  %566 = vmatprep.subr.bf16.mxu1 %v2277_v44  ;;  %v2306_v19 = vld [vmem:[#allocation5 + $0x1e8] ss:$16 sps:$4 sm:$0xff]   ;;  %v2312_v21 = vld [vmem:[#allocation7 + $0xc] ss:$16 sps:$4 sm:$0xff]   ;;  %v2339_v22 = vld [vmem:[#allocation7 + $0xa4] ss:$16 sps:$4 sm:$0xff]  }
  0x65   :  { %527 = vmatprep.subr.bf16.mxu0 %v2232_v23  ;;  %v2337_v23 = vld [vmem:[#allocation7 + $0xa0] ss:$16 sps:$4 sm:$0xff]   ;;  %v2345_v24 = vld [vmem:[#allocation7 + $0xc4] ss:$16 sps:$4 sm:$0xff]   ;;  %v2310_v25 = vld [vmem:[#allocation7 + $0x8] ss:$16 sps:$4 sm:$0xff]  }
  0x66   :  { %v2318_v26 = vld [vmem:[#allocation7 + $0x2c] ss:$16 sps:$4 sm:$0xff]   ;;  %v2343_v27 = vld [vmem:[#allocation7 + $0xc0] ss:$16 sps:$4 sm:$0xff]   ;;  %v2351_v28 = vld [vmem:[#allocation7 + $0xe4] ss:$16 sps:$4 sm:$0xff]  }
  0x67   :  { %567 = vmatpush1.bf16.msra.mxu1 %v2279_v47  ;;  %v2349_v31 = vld [vmem:[#allocation7 + $0xe0] ss:$16 sps:$4 sm:$0xff]   ;;  %v2357_v32 = vld [vmem:[#allocation7 + $0x104] ss:$16 sps:$4 sm:$0xff]   ;;  %s1909_s30 = sshll.u32 %s2658_s29, 4  ;;  %s1910_s30 = int_to_ptr.vmem [resolvable:$true] %s1909_s30 }
  0x68   :  { %528 = vmatpush1.bf16.msra.mxu0 %v2234_v29  ;;  %568 = vmatprep.subr.bf16.mxu1 %v2280_v48  ;;  %v2316_v29 = vld [vmem:[#allocation7 + $0x28] ss:$16 sps:$4 sm:$0xff]   ;;  %v2355_v35 = vld [vmem:[#allocation7 + $0x100] ss:$16 sps:$4 sm:$0xff]   ;;  %v2363_v36 = vld [vmem:[#allocation7 + $0x124] ss:$16 sps:$4 sm:$0xff]   ;;  %p2624_p5 = scmp.lt.s32.totalorder %s1910_s30, %s1910_s30 }
  0x69   :  { %529 = vmatprep.subr.bf16.mxu0 %v2235_v30  ;;  %v2324_v30 = vld [vmem:[#allocation7 + $0x4c] ss:$16 sps:$4 sm:$0xff]   ;;  %v2361_v39 = vld [vmem:[#allocation7 + $0x120] ss:$16 sps:$4 sm:$0xff]   ;;  %v2369_v40 = vld [vmem:[#allocation7 + $0x144] ss:$16 sps:$4 sm:$0xff]  }
  0x6a   :  { %v2367_v43 = vld [vmem:[#allocation7 + $0x140] ss:$16 sps:$4 sm:$0xff]   ;;  %v2375_v44 = vld [vmem:[#allocation7 + $0x164] ss:$16 sps:$4 sm:$0xff]   ;;  %s2619_s8 = scalar_lea.vmem %s1910_s30, 16  ;;  %s2623_s9 = scalar_lea.vmem %s1910_s30, 32 }
  0x6b   :  { %569 = vmatpush1.bf16.msra.mxu1 %v2282_v51  ;;  %v2373_v47 = vld [vmem:[#allocation7 + $0x160] ss:$16 sps:$4 sm:$0xff]   ;;  %v2381_v48 = vld [vmem:[#allocation7 + $0x184] ss:$16 sps:$4 sm:$0xff]   ;;  %p2620_p4 = scmp.ne.s32.totalorder %s1910_s30, %s2619_s8  ;;  %p2625_p6 = scmp.lt.s32.totalorder %s2623_s9, %s2619_s8 }
  0x6c   :  { %530 = vmatpush1.bf16.msra.mxu0 %v2237_v33  ;;  %570 = vmatprep.subr.bf16.mxu1 %v2283_v52  ;;  %v2322_v33 = vld [vmem:[#allocation7 + $0x48] ss:$16 sps:$4 sm:$0xff]   ;;  %v2379_v51 = vld [vmem:[#allocation7 + $0x180] ss:$16 sps:$4 sm:$0xff]   ;;  %v2387_v52 = vld [vmem:[#allocation7 + $0x1a4] ss:$16 sps:$4 sm:$0xff]  }
  0x6d   :  { %531 = vmatprep.subr.bf16.mxu0 %v2238_v34  ;;  %v2330_v34 = vld [vmem:[#allocation7 + $0x6c] ss:$16 sps:$4 sm:$0xff]   ;;  %p2626_p7 = por %p2625_p6, %p2624_p5 }
  0x6f   :  { %571 = vmatpush1.bf16.msra.mxu1 %v2285_v55  ;;  %v2385_v55 = vld [vmem:[#allocation7 + $0x1a0] ss:$16 sps:$4 sm:$0xff]   ;;  %p2627_p8 = pnand %p2626_p7, %p2620_p4 }
  0x70   :  { %532 = vmatpush1.bf16.msra.mxu0 %v2240_v37  ;;  %572 = vmatprep.subr.bf16.mxu1 %v2286_v56  ;;  %v2328_v37 = vld [vmem:[#allocation7 + $0x68] ss:$16 sps:$4 sm:$0xff]  }
  0x71   :  { %533 = vmatprep.subr.bf16.mxu0 %v2241_v38  ;;  %v2336_v38 = vld [vmem:[#allocation7 + $0x8c] ss:$16 sps:$4 sm:$0xff]   ;;  %v2358_v56 = vld [vmem:[#allocation7 + $0x108] ss:$16 sps:$4 sm:$0xff]  }
  0x73   :  { %573 = vmatpush1.bf16.msra.mxu1 %v2288_v59  ;;  %v2372_v59 = vld [vmem:[#allocation7 + $0x14c] ss:$16 sps:$4 sm:$0xff]  }
  0x74   :  { %534 = vmatpush1.bf16.msra.mxu0 %v2243_v41  ;;  %574 = vmatprep.subr.bf16.mxu1 %v2289_v60  ;;  %v2334_v41 = vld [vmem:[#allocation7 + $0x88] ss:$16 sps:$4 sm:$0xff]  }
  0x75   :  { %535 = vmatprep.subr.bf16.mxu0 %v2244_v42  ;;  %v2342_v42 = vld [vmem:[#allocation7 + $0xac] ss:$16 sps:$4 sm:$0xff]   ;;  %v2370_v60 = vld [vmem:[#allocation7 + $0x148] ss:$16 sps:$4 sm:$0xff]  }
  0x77   :  { %575 = vmatpush1.bf16.msra.mxu1 %v2291_v63  ;;  %v2384_v63 = vld [vmem:[#allocation7 + $0x18c] ss:$16 sps:$4 sm:$0xff]  }
  0x78   :  { %536 = vmatpush1.bf16.msra.mxu0 %v2246_v45  ;;  %576 = vmatprep.subr.bf16.mxu1 %v2292_v1  ;;  %v2340_v45 = vld [vmem:[#allocation7 + $0xa8] ss:$16 sps:$4 sm:$0xff]   ;;  %v2390_v1 = vld [vmem:[#allocation7 + $0x1ac] ss:$16 sps:$4 sm:$0xff]  }
  0x79   :  { %537 = vmatprep.subr.bf16.mxu0 %v2247_v46  ;;  %v2348_v46 = vld [vmem:[#allocation7 + $0xcc] ss:$16 sps:$4 sm:$0xff]  }
  0x7b   :  { %577 = vmatpush1.bf16.msra.mxu1 %v2294_v4  ;;  %v2396_v4 = vld [vmem:[#allocation7 + $0x1cc] ss:$16 sps:$4 sm:$0xff]  }
  0x7c   :  { %538 = vmatpush1.bf16.msra.mxu0 %v2249_v49  ;;  %578 = vmatprep.subr.bf16.mxu1 %v2295_v5  ;;  %v2346_v49 = vld [vmem:[#allocation7 + $0xc8] ss:$16 sps:$4 sm:$0xff]   ;;  %v2391_v5 = vld [vmem:[#allocation7 + $0x1c0] ss:$16 sps:$4 sm:$0xff]  }
  0x7d   :  { %539 = vmatprep.subr.bf16.mxu0 %v2250_v50  ;;  %v2354_v50 = vld [vmem:[#allocation7 + $0xec] ss:$16 sps:$4 sm:$0xff]  }
  0x7f   :  { %579 = vmatpush1.bf16.msra.mxu1 %v2297_v8  ;;  %v2402_v8 = vld [vmem:[#allocation7 + $0x1ec] ss:$16 sps:$4 sm:$0xff]  }
  0x80   :  { %540 = vmatpush1.bf16.msra.mxu0 %v2252_v53  ;;  %580 = vmatprep.subr.bf16.mxu1 %v2298_v9  ;;  %v2352_v53 = vld [vmem:[#allocation7 + $0xe8] ss:$16 sps:$4 sm:$0xff]   ;;  %v2397_v9 = vld [vmem:[#allocation7 + $0x1e0] ss:$16 sps:$4 sm:$0xff]  }
  0x81   :  { %541 = vmatprep.subr.bf16.mxu0 %v2253_v54  ;;  %v2360_v54 = vld [vmem:[#allocation7 + $0x10c] ss:$16 sps:$4 sm:$0xff]  }
  0x83   :  { %581 = vmatpush1.bf16.msra.mxu1 %v2300_v12  ;;  %v2408_v12 = vld [vmem:[#allocation7 + $0x20c] ss:$16 sps:$4 sm:$0xff]  }
  0x84   :  { %542 = vmatpush1.bf16.msra.mxu0 %v2255_v57  ;;  %582 = vmatprep.subr.bf16.mxu1 %v2301_v13  ;;  %v2366_v57 = vld [vmem:[#allocation7 + $0x12c] ss:$16 sps:$4 sm:$0xff]   ;;  %v495_v13 = vsub.s32 0, %v2753_v15 }
  0x85   :  { %543 = vmatprep.subr.bf16.mxu0 %v2256_v58  ;;  %v2364_v58 = vld [vmem:[#allocation7 + $0x128] ss:$16 sps:$4 sm:$0xff]  }
  0x87   :  { %583 = vmatpush1.bf16.msra.mxu1 %v2303_v17 }
  0x88   :  { %544 = vmatpush1.bf16.msra.mxu0 %v2260_v61  ;;  %584 = vmatprep.subr.bf16.mxu1 %v2304_v18  ;;  %v2378_v61 = vld [vmem:[#allocation7 + $0x16c] ss:$16 sps:$4 sm:$0xff]  }
  0x89   :  { %1393 = vmatprep.subr.bf16.mxu0 %v2309_v62  ;;  %v2376_v62 = vld [vmem:[#allocation7 + $0x168] ss:$16 sps:$4 sm:$0xff]  }
  0x8b   :  { %546 = vmatmul.mubr.bf16.vlgmr.msra.gmra.mrb[0].mxu0 %v162_v0  ;;  %585 = vmatpush1.bf16.msra.mxu1 %v2306_v19 }
  0x8c   :  { %1394 = vmatpush1.bf16.msra.mxu0 %v2307_v2  ;;  %1475 = vmatprep.subr.bf16.mxu1 %v2312_v21  ;;  %v2388_v2 = vld [vmem:[#allocation7 + $0x1a8] ss:$16 sps:$4 sm:$0xff]  }
  0x8d   :  { %1395 = vmatprep.subr.bf16.mxu0 %v2315_v3  ;;  %v2393_v3 = vld [vmem:[#allocation7 + $0x1c4] ss:$16 sps:$4 sm:$0xff]  }
  0x8e   :  { %587 = vmatmul.mubr.bf16.vlgmr.msra.gmra.mrb[0].mxu1 %v162_v0  ;;  %v2382_v0 = vld [vmem:[#allocation7 + $0x188] ss:$16 sps:$4 sm:$0xff]  }
  0x8f   :  { %1476 = vmatpush1.bf16.msra.mxu1 %v2310_v25 }
  0x90   :  { %1396 = vmatpush1.bf16.msra.mxu0 %v2313_v6  ;;  %1477 = vmatprep.subr.bf16.mxu1 %v2318_v26  ;;  %v2394_v6 = vld [vmem:[#allocation7 + $0x1c8] ss:$16 sps:$4 sm:$0xff]  }
  0x91   :  { %1397 = vmatprep.subr.bf16.mxu0 %v2321_v7  ;;  %v2399_v7 = vld [vmem:[#allocation7 + $0x1e4] ss:$16 sps:$4 sm:$0xff]  }
  0x93   :  { %1478 = vmatpush1.bf16.msra.mxu1 %v2316_v29  ;;  %v2406_v29 = vld [vmem:[#allocation7 + $0x208] ss:$16 sps:$4 sm:$0xff]  }
  0x94   :  { %1398 = vmatpush1.bf16.msra.mxu0 %v2319_v10  ;;  %1479 = vmatprep.subr.bf16.mxu1 %v2324_v30  ;;  %v2400_v10 = vld [vmem:[#allocation7 + $0x1e8] ss:$16 sps:$4 sm:$0xff]  }
  0x95   :  { %1399 = vmatprep.subr.bf16.mxu0 %v2327_v11  ;;  %v2405_v11 = vld [vmem:[#allocation7 + $0x204] ss:$16 sps:$4 sm:$0xff]  }
  0x97   :  { %1480 = vmatpush1.bf16.msra.mxu1 %v2322_v33  ;;  %v2409_v33 = vld [vmem:[#allocation7 + $0x220] ss:$16 sps:$4 sm:$0xff]  }
  0x98   :  { %1400 = vmatpush1.bf16.msra.mxu0 %v2325_v14  ;;  %1481 = vmatprep.subr.bf16.mxu1 %v2330_v34  ;;  %v2769_v14 = vld [vmem:[%s2817_s2] sm:$0xf]  ;;  %v2412_v34 = vld [vmem:[#allocation7 + $0x228] ss:$16 sps:$4 sm:$0xff]  }
  0x99   :  { %1401 = vmatprep.subr.bf16.mxu0 %v2333_v16  ;;  %v499_v16 = vsub.s32 1, %v2753_v15  ;;  %v496_v17 = vrot.slane %v2769_v14, %v495_v13 }
  0x9b   :  { %1482 = vmatpush1.bf16.msra.mxu1 %v2328_v37  ;;  %v500_v18 = vrot.slane %v2769_v14, %v499_v16  ;;  %v2415_v37 = vld [vmem:[#allocation7 + $0x240] ss:$16 sps:$4 sm:$0xff]  }
  0x9c   :  { %1402 = vmatpush1.bf16.msra.mxu0 %v2331_v20  ;;  %1483 = vmatprep.subr.bf16.mxu1 %v2336_v38  ;;  %v2418_v38 = vld [vmem:[#allocation7 + $0x248] ss:$16 sps:$4 sm:$0xff]  }
  0x9d   :  { %1403 = vmatprep.subr.bf16.mxu0 %v2339_v22 }
  0x9f   :  { %1484 = vmatpush1.bf16.msra.mxu1 %v2334_v41  ;;  %v507_v41 = vsub.s32 3, %v2753_v15 }
  0xa0   :  { %1404 = vmatpush1.bf16.msra.mxu0 %v2337_v23  ;;  %1485 = vmatprep.subr.bf16.mxu1 %v2342_v42  ;;  %v2421_v42 = vld [vmem:[#allocation7 + $0x260] ss:$16 sps:$4 sm:$0xff]  }
  0xa1   :  { %1405 = vmatprep.subr.bf16.mxu0 %v2345_v24 }
  0xa3   :  { %1486 = vmatpush1.bf16.msra.mxu1 %v2340_v45  ;;  %v2432_v45 = vld [vmem:[#allocation7 + $0x28c] ss:$16 sps:$4 sm:$0xff]  }
  0xa4   :  { %1406 = vmatpush1.bf16.msra.mxu0 %v2343_v27  ;;  %1487 = vmatprep.subr.bf16.mxu1 %v2348_v46  ;;  %v508_v46 = vrot.slane %v2769_v14, %v507_v41 }
  0xa5   :  { %1407 = vmatprep.subr.bf16.mxu0 %v2351_v28  ;;  %v2403_v28 = vld [vmem:[#allocation7 + $0x200] ss:$16 sps:$4 sm:$0xff]  }
  0xa7   :  { %1488 = vmatpush1.bf16.msra.mxu1 %v2346_v49 }
  0xa8   :  { %1408 = vmatpush1.bf16.msra.mxu0 %v2349_v31  ;;  %1489 = vmatprep.subr.bf16.mxu1 %v2354_v50  ;;  %v2411_v31 = vld [vmem:[#allocation7 + $0x224] ss:$16 sps:$4 sm:$0xff]  }
  0xa9   :  { %1409 = vmatprep.subr.bf16.mxu0 %v2357_v32  ;;  %v2414_v32 = vld [vmem:[#allocation7 + $0x22c] ss:$16 sps:$4 sm:$0xff]   ;;  %v2435_v50 = vld [vmem:[#allocation7 + $0x2a4] ss:$16 sps:$4 sm:$0xff]  }
  0xab   :  { %1490 = vmatpush1.bf16.msra.mxu1 %v2352_v53 }
  0xac   :  { %1410 = vmatpush1.bf16.msra.mxu0 %v2355_v35  ;;  %1491 = vmatprep.subr.bf16.mxu1 %v2360_v54  ;;  %v2417_v35 = vld [vmem:[#allocation7 + $0x244] ss:$16 sps:$4 sm:$0xff]  }
  0xad   :  { %1411 = vmatprep.subr.bf16.mxu0 %v2363_v36  ;;  %v2420_v36 = vld [vmem:[#allocation7 + $0x24c] ss:$16 sps:$4 sm:$0xff]  }
  0xaf   :  { %1492 = vmatpush1.bf16.msra.mxu1 %v2358_v56  ;;  %v2433_v56 = vld [vmem:[#allocation7 + $0x2a0] ss:$16 sps:$4 sm:$0xff]  }
  0xb0   :  { %1412 = vmatpush1.bf16.msra.mxu0 %v2361_v39  ;;  %1493 = vmatprep.subr.bf16.mxu1 %v2366_v57  ;;  %v2423_v39 = vld [vmem:[#allocation7 + $0x264] ss:$16 sps:$4 sm:$0xff]   ;;  %v2436_v57 = vld [vmem:[#allocation7 + $0x2a8] ss:$16 sps:$4 sm:$0xff]  }
  0xb1   :  { %1413 = vmatprep.subr.bf16.mxu0 %v2369_v40  ;;  %v2426_v40 = vld [vmem:[#allocation7 + $0x26c] ss:$16 sps:$4 sm:$0xff]  }
  0xb3   :  { %1494 = vmatpush1.bf16.msra.mxu1 %v2364_v58 }
  0xb4   :  { %1414 = vmatpush1.bf16.msra.mxu0 %v2367_v43  ;;  %1495 = vmatprep.subr.bf16.mxu1 %v2372_v59  ;;  %v2424_v43 = vld [vmem:[#allocation7 + $0x268] ss:$16 sps:$4 sm:$0xff]   ;;  %v2441_v59 = vld [vmem:[#allocation7 + $0x2c4] ss:$16 sps:$4 sm:$0xff]  }
  0xb5   :  { %1415 = vmatprep.subr.bf16.mxu0 %v2375_v44  ;;  %v2429_v44 = vld [vmem:[#allocation7 + $0x284] ss:$16 sps:$4 sm:$0xff]  }
  0xb7   :  { %1496 = vmatpush1.bf16.msra.mxu1 %v2370_v60  ;;  %v2444_v60 = vld [vmem:[#allocation7 + $0x2cc] ss:$16 sps:$4 sm:$0xff]  }
  0xb8   :  { %1416 = vmatpush1.bf16.msra.mxu0 %v2373_v47  ;;  %1497 = vmatprep.subr.bf16.mxu1 %v2378_v61  ;;  %v2427_v47 = vld [vmem:[#allocation7 + $0x280] ss:$16 sps:$4 sm:$0xff]  }
  0xb9   :  { %1417 = vmatprep.subr.bf16.mxu0 %v2381_v48  ;;  %v2430_v48 = vld [vmem:[#allocation7 + $0x288] ss:$16 sps:$4 sm:$0xff]  }
  0xbb   :  { %1498 = vmatpush1.bf16.msra.mxu1 %v2376_v62  ;;  %v2439_v62 = vld [vmem:[#allocation7 + $0x2c0] ss:$16 sps:$4 sm:$0xff]  }
  0xbc   :  { %1418 = vmatpush1.bf16.msra.mxu0 %v2379_v51  ;;  %1499 = vmatprep.subr.bf16.mxu1 %v2384_v63  ;;  %v2438_v51 = vld [vmem:[#allocation7 + $0x2ac] ss:$16 sps:$4 sm:$0xff]   ;;  %v2442_v63 = vld [vmem:[#allocation7 + $0x2c8] ss:$16 sps:$4 sm:$0xff]  }
  0xbd   :  { %1419 = vmatprep.subr.bf16.mxu0 %v2387_v52 }
  0xbf   :  { %1500 = vmatpush1.bf16.msra.mxu1 %v2382_v0  ;;  %v2447_v0 = vld [vmem:[#allocation7 + $0x2e4] ss:$16 sps:$4 sm:$0xff]  }
  0xc0   :  { %1420 = vmatpush1.bf16.msra.mxu0 %v2385_v55  ;;  %1501 = vmatprep.subr.bf16.mxu1 %v2390_v1  ;;  %v2450_v1 = vld [vmem:[#allocation7 + $0x2ec] ss:$16 sps:$4 sm:$0xff]  }
  0xc1   :  { %1421 = vmatprep.subr.bf16.mxu0 %v2393_v3  ;;  %v2448_v3 = vld [vmem:[#allocation7 + $0x2e8] ss:$16 sps:$4 sm:$0xff]  }
  0xc3   :  { %1502 = vmatpush1.bf16.msra.mxu1 %v2388_v2  ;;  %v2445_v2 = vld [vmem:[#allocation7 + $0x2e0] ss:$16 sps:$4 sm:$0xff]  }
  0xc4   :  { %1503 = vmatprep.subr.bf16.mxu1 %v2396_v4  ;;  %1422 = vmatpush1.bf16.msra.mxu0 %v2391_v5  ;;  %v2453_v4 = vld [vmem:[#allocation7 + $0x304] ss:$16 sps:$4 sm:$0xff]   ;;  %v2456_v5 = vld [vmem:[#allocation7 + $0x30c] ss:$16 sps:$4 sm:$0xff]  }
  0xc5   :  { %1423 = vmatprep.subr.bf16.mxu0 %v2399_v7  ;;  %v2454_v7 = vld [vmem:[#allocation7 + $0x308] ss:$16 sps:$4 sm:$0xff]  }
  0xc7   :  { %1504 = vmatpush1.bf16.msra.mxu1 %v2394_v6  ;;  %v2451_v6 = vld [vmem:[#allocation7 + $0x300] ss:$16 sps:$4 sm:$0xff]  }
  0xc8   :  { %1505 = vmatprep.subr.bf16.mxu1 %v2402_v8  ;;  %1424 = vmatpush1.bf16.msra.mxu0 %v2397_v9  ;;  %v2459_v8 = vld [vmem:[#allocation7 + $0x324] ss:$16 sps:$4 sm:$0xff]   ;;  %v2462_v9 = vld [vmem:[#allocation7 + $0x32c] ss:$16 sps:$4 sm:$0xff]  }
  0xc9   :  { %1434 = vmatprep.subr.bf16.mxu0 %v2405_v11  ;;  %v2460_v11 = vld [vmem:[#allocation7 + $0x328] ss:$16 sps:$4 sm:$0xff]  }
  0xcb   :  { %1506 = vmatpush1.bf16.msra.mxu1 %v2400_v10  ;;  %v2457_v10 = vld [vmem:[#allocation7 + $0x320] ss:$16 sps:$4 sm:$0xff]  }
  0xcc   :  { %1516 = vmatprep.subr.bf16.mxu1 %v2408_v12  ;;  %v2465_v12 = vld [vmem:[#allocation7 + $0x344] ss:$16 sps:$4 sm:$0xff]  }
 0x15e   :  { %v547_v19 = vpop.f32.mrb[0].mxu0 }
 0x15f   :  { %v548_v20 = vadd.f32 %v547_v19, %v496_v17  ;;  %v549_v21 = vpop.f32.mrb[1].mxu0  ;;  %v2468_v17 = vld [vmem:[#allocation7 + $0x34c] ss:$16 sps:$4 sm:$0xff]   ;;  %v2466_v19 = vld [vmem:[#allocation7 + $0x348] ss:$16 sps:$4 sm:$0xff]  }
 0x160   :  { %v550_v22 = vadd.f32 %v549_v21, %v500_v18  ;;  %v551_v23 = vpop.f32.mrb[2].mxu0  ;;  %v2463_v18 = vld [vmem:[#allocation7 + $0x340] ss:$16 sps:$4 sm:$0xff]   ;;  %v2474_v21 = vld [vmem:[#allocation7 + $0x36c] ss:$16 sps:$4 sm:$0xff]  }
 0x161   :  { %v595_v24 = vmax.f32 %v548_v20, 0.0  ;;  %v552_v25 = vpop.f32.mrb[3].mxu0  ;;  %v2782_v49 = vpop.f32.mrb[0].mxu1  ;;  %v2471_v20 = vld [vmem:[#allocation7 + $0x364] ss:$16 sps:$4 sm:$0xff]  }
 0x162   :  { %v596_v26 = vmax.f32 %v550_v22, 0.0  ;;  %v590_v52 = vpop.f32.mrb[1].mxu1  ;;  %v2469_v22 = vld [vmem:[#allocation7 + $0x360] ss:$16 sps:$4 sm:$0xff]   ;;  %v2472_v23 = vld [vmem:[#allocation7 + $0x368] ss:$16 sps:$4 sm:$0xff]  }
 0x163   :  { %v599_v30 = vpack.c.bf16 %v595_v24, %v595_v24  ;;  %v591_v53 = vadd.f32 %v590_v52, %v508_v46  ;;  %v592_v54 = vpop.f32.mrb[2].mxu1  ;;  %v2477_v24 = vld [vmem:[#allocation7 + $0x384] ss:$16 sps:$4 sm:$0xff]   ;;  %v2480_v25 = vld [vmem:[#allocation7 + $0x38c] ss:$16 sps:$4 sm:$0xff]  }
 0x164   :  { %v600_v27 = vpack.c.bf16 %v596_v26, %v596_v26  ;;  %v593_v55 = vpop.f32.mrb[3].mxu1  ;;  %v2475_v26 = vld [vmem:[#allocation7 + $0x380] ss:$16 sps:$4 sm:$0xff]   ;;  %v2506_v52 = vld [vmem:[#allocation8 + $0x88] sm:$0xff]  }
 0x165   :  { %v598_v58 = vmax.f32 %v591_v53, 0.0  ;;  %v2501_v46 = vld [vmem:[#allocation8] sm:$0xff]   ;;  %v2507_v53 = vld [vmem:[#allocation8 + $0x50] sm:$0xff]  }
 0x166   :  { %1425 = vmatprep.mubr.bf16.mxu0 %v600_v27  ;;  %1507 = vmatprep.mubr.bf16.mxu1 %v600_v27  ;;  %v2478_v27 = vld [vmem:[#allocation7 + $0x388] ss:$16 sps:$4 sm:$0xff]   ;;  %v2508_v54 = vld [vmem:[#allocation8 + $0xd0] sm:$0xff]  }
 0x167   :  { %1426 = vmatmul.mubr.bf16.vlgmr.msra.gmra.mrb[4].mxu0 %v599_v30  ;;  %1508 = vmatmul.mubr.bf16.vlgmr.msra.gmra.mrb[4].mxu1 %v599_v30  ;;  %v602_v61 = vpack.c.bf16 %v598_v58, %v598_v58  ;;  %v2486_v30 = vld [vmem:[#allocation7 + $0x3ac] ss:$16 sps:$4 sm:$0xff]   ;;  %v2509_v55 = vld [vmem:[#allocation8 + $0x10] sm:$0xff]  }
 0x168   :  { %1435 = vmatpush1.bf16.msra.mxu0 %v2403_v28  ;;  %1517 = vmatpush1.bf16.msra.mxu1 %v2406_v29  ;;  %v503_v28 = vsub.s32 2, %v2753_v15  ;;  %v2483_v29 = vld [vmem:[#allocation7 + $0x3a4] ss:$16 sps:$4 sm:$0xff]   ;;  %v2512_v58 = vld [vmem:[#allocation8 + $0xd8] sm:$0xff]  }
 0x169   :  { %1436 = vmatprep.subr.bf16.mxu0 %v2411_v31  ;;  %1518 = vmatprep.subr.bf16.mxu1 %v2414_v32  ;;  %v2481_v31 = vld [vmem:[#allocation7 + $0x3a0] ss:$16 sps:$4 sm:$0xff]   ;;  %v2484_v32 = vld [vmem:[#allocation7 + $0x3a8] ss:$16 sps:$4 sm:$0xff]  }
 0x16a   :  { %1466 = vmatprep.mubr.bf16.mxu0 %v602_v61  ;;  %1548 = vmatprep.mubr.bf16.mxu1 %v602_v61  ;;  %v2515_v61 = vld [vmem:[#allocation8 + $0x60] sm:$0xff]  }
 0x16c   :  { %1437 = vmatpush1.bf16.msra.mxu0 %v2409_v33  ;;  %1519 = vmatpush1.bf16.msra.mxu1 %v2412_v34  ;;  %v504_v33 = vrot.slane %v2769_v14, %v503_v28  ;;  %v2489_v34 = vld [vmem:[#allocation7 + $0x3c4] ss:$16 sps:$4 sm:$0xff]  }
 0x16d   :  { %1438 = vmatprep.subr.bf16.mxu0 %v2417_v35  ;;  %1520 = vmatprep.subr.bf16.mxu1 %v2420_v36  ;;  %v2492_v35 = vld [vmem:[#allocation7 + $0x3cc] ss:$16 sps:$4 sm:$0xff]   ;;  %v2487_v36 = vld [vmem:[#allocation7 + $0x3c0] ss:$16 sps:$4 sm:$0xff]  }
 0x16e   :  { %v2499_v14 = vld [vmem:[#allocation8 + $0x40] sm:$0xff]  }
 0x170   :  { %1439 = vmatpush1.bf16.msra.mxu0 %v2415_v37  ;;  %1521 = vmatpush1.bf16.msra.mxu1 %v2418_v38  ;;  %v2490_v37 = vld [vmem:[#allocation7 + $0x3c8] ss:$16 sps:$4 sm:$0xff]   ;;  %v589_v38 = vadd.f32 %v2782_v49, %v504_v33 }
 0x171   :  { %1440 = vmatprep.subr.bf16.mxu0 %v2423_v39  ;;  %1522 = vmatprep.subr.bf16.mxu1 %v2426_v40  ;;  %v2495_v39 = vld [vmem:[#allocation7 + $0x3e4] ss:$16 sps:$4 sm:$0xff]   ;;  %v2498_v40 = vld [vmem:[#allocation7 + $0x3ec] ss:$16 sps:$4 sm:$0xff]  }
 0x172   :  { %v2503_v49 = vld [vmem:[#allocation8 + $0x48] sm:$0xff]  }
 0x174   :  { %1441 = vmatpush1.bf16.msra.mxu0 %v2421_v42  ;;  %1523 = vmatpush1.bf16.msra.mxu1 %v2424_v43  ;;  %v2493_v42 = vld [vmem:[#allocation7 + $0x3e0] ss:$16 sps:$4 sm:$0xff]   ;;  %v2496_v43 = vld [vmem:[#allocation7 + $0x3e8] ss:$16 sps:$4 sm:$0xff]  }
 0x175   :  { %1442 = vmatprep.subr.bf16.mxu0 %v2429_v44  ;;  %1524 = vmatprep.subr.bf16.mxu1 %v2432_v45  ;;  %v597_v44 = vmax.f32 %v589_v38, 0.0  ;;  %v2500_v45 = vld [vmem:[#allocation8 + $0xc0] sm:$0xff]  }
 0x178   :  { %1443 = vmatpush1.bf16.msra.mxu0 %v2427_v47  ;;  %1525 = vmatpush1.bf16.msra.mxu1 %v2430_v48  ;;  %v2502_v47 = vld [vmem:[#allocation8 + $0x80] sm:$0xff]   ;;  %v601_v48 = vpack.c.bf16 %v597_v44, %v597_v44 }
 0x179   :  { %1444 = vmatprep.subr.bf16.mxu0 %v2435_v50  ;;  %1526 = vmatprep.subr.bf16.mxu1 %v2438_v51  ;;  %v2504_v50 = vld [vmem:[#allocation8 + $0xc8] sm:$0xff]  }
 0x17a   :  { %v2505_v51 = vld [vmem:[#allocation8 + $0x8] sm:$0xff]  }
 0x17c   :  { %1445 = vmatpush1.bf16.msra.mxu0 %v2433_v56  ;;  %1527 = vmatpush1.bf16.msra.mxu1 %v2436_v57  ;;  %v2510_v56 = vld [vmem:[#allocation8 + $0x90] sm:$0xff]   ;;  %v2511_v57 = vld [vmem:[#allocation8 + $0x58] sm:$0xff]  }
 0x17d   :  { %1446 = vmatprep.subr.bf16.mxu0 %v2441_v59  ;;  %1528 = vmatprep.subr.bf16.mxu1 %v2444_v60  ;;  %v2513_v59 = vld [vmem:[#allocation8 + $0x18] sm:$0xff]  }
 0x17e   :  { %v2514_v60 = vld [vmem:[#allocation8 + $0x98] sm:$0xff]  }
 0x180   :  { %1447 = vmatpush1.bf16.msra.mxu0 %v2439_v62  ;;  %1529 = vmatpush1.bf16.msra.mxu1 %v2442_v63  ;;  %v2516_v62 = vld [vmem:[#allocation8 + $0xe0] sm:$0xff]  }
 0x181   :  { %1448 = vmatprep.subr.bf16.mxu0 %v2447_v0  ;;  %1530 = vmatprep.subr.bf16.mxu1 %v2450_v1  ;;  %v2517_v63 = vld [vmem:[#allocation8 + $0x20] sm:$0xff]   ;;  %v2519_v1 = vld [vmem:[#allocation8 + $0x68] sm:$0xff]  }
 0x182   :  { %v2518_v0 = vld [vmem:[#allocation8 + $0xa0] sm:$0xff]  }
 0x184   :  { %1449 = vmatpush1.bf16.msra.mxu0 %v2445_v2  ;;  %1531 = vmatpush1.bf16.msra.mxu1 %v2448_v3  ;;  %v2520_v2 = vld [vmem:[#allocation8 + $0xe8] sm:$0xff]  }
 0x185   :  { %1450 = vmatprep.subr.bf16.mxu0 %v2453_v4  ;;  %1532 = vmatprep.subr.bf16.mxu1 %v2456_v5  ;;  %v2521_v3 = vld [vmem:[#allocation8 + $0x28] sm:$0xff]   ;;  %v2523_v5 = vld [vmem:[#allocation8 + $0x70] sm:$0xff]  }
 0x186   :  { %v2522_v4 = vld [vmem:[#allocation8 + $0xa8] sm:$0xff]  }
 0x188   :  { %1451 = vmatpush1.bf16.msra.mxu0 %v2451_v6  ;;  %1533 = vmatpush1.bf16.msra.mxu1 %v2454_v7  ;;  %v2524_v6 = vld [vmem:[#allocation8 + $0xf0] sm:$0xff]  }
 0x189   :  { %1452 = vmatprep.subr.bf16.mxu0 %v2459_v8  ;;  %1534 = vmatprep.subr.bf16.mxu1 %v2462_v9  ;;  %v2525_v7 = vld [vmem:[#allocation8 + $0x30] sm:$0xff]   ;;  %v2527_v9 = vld [vmem:[#allocation8 + $0x78] sm:$0xff]  }
 0x18a   :  { %v2526_v8 = vld [vmem:[#allocation8 + $0xb0] sm:$0xff]  }
 0x18c   :  { %1453 = vmatpush1.bf16.msra.mxu0 %v2457_v10  ;;  %1535 = vmatpush1.bf16.msra.mxu1 %v2460_v11  ;;  %v2528_v10 = vld [vmem:[#allocation8 + $0xf8] sm:$0xff]  }
 0x18d   :  { %1454 = vmatprep.subr.bf16.mxu0 %v2465_v12  ;;  %1536 = vmatprep.subr.bf16.mxu1 %v2468_v17  ;;  %v2529_v11 = vld [vmem:[#allocation8 + $0x38] sm:$0xff]   ;;  %v731_v17 = vld [vmem:[%s2819_s4] sm:$0xf] }
 0x18e   :  { %v2530_v12 = vld [vmem:[#allocation8 + $0xb8] sm:$0xff]  }
 0x190   :  { %1455 = vmatpush1.bf16.msra.mxu0 %v2463_v18  ;;  %1537 = vmatpush1.bf16.msra.mxu1 %v2466_v19  ;;  %v1376_v18 = vrot.slane %v731_v17, %v495_v13  ;;  %v1384_v19 = vrot.slane %v731_v17, %v503_v28 }
 0x191   :  { %1456 = vmatprep.subr.bf16.mxu0 %v2471_v20  ;;  %1538 = vmatprep.subr.bf16.mxu1 %v2474_v21  ;;  %v1380_v20 = vrot.slane %v731_v17, %v499_v16  ;;  %v1388_v21 = vrot.slane %v731_v17, %v507_v41 }
 0x194   :  { %1457 = vmatpush1.bf16.msra.mxu0 %v2469_v22  ;;  %1539 = vmatpush1.bf16.msra.mxu1 %v2472_v23 }
 0x195   :  { %1458 = vmatprep.subr.bf16.mxu0 %v2477_v24  ;;  %1540 = vmatprep.subr.bf16.mxu1 %v2480_v25 }
 0x198   :  { %1459 = vmatpush1.bf16.msra.mxu0 %v2475_v26  ;;  %1541 = vmatpush1.bf16.msra.mxu1 %v2478_v27 }
 0x199   :  { %1460 = vmatprep.subr.bf16.mxu0 %v2483_v29  ;;  %1542 = vmatprep.subr.bf16.mxu1 %v2486_v30 }
 0x19c   :  { %1461 = vmatpush1.bf16.msra.mxu0 %v2481_v31  ;;  %1543 = vmatpush1.bf16.msra.mxu1 %v2484_v32 }
 0x19d   :  { %1462 = vmatprep.subr.bf16.mxu0 %v2489_v34  ;;  %1544 = vmatprep.subr.bf16.mxu1 %v2492_v35 }
 0x1a0   :  { %1463 = vmatpush1.bf16.msra.mxu0 %v2487_v36  ;;  %1545 = vmatpush1.bf16.msra.mxu1 %v2490_v37 }
 0x1a1   :  { %1464 = vmatprep.subr.bf16.mxu0 %v2495_v39  ;;  %1546 = vmatprep.subr.bf16.mxu1 %v2498_v40  ;;  %v1629_v40 = vld [vmem:[%s2821_s6] sm:$0x1] }
 0x1a4   :  { %1465 = vmatpush1.bf16.msra.mxu0 %v2493_v42  ;;  %1547 = vmatpush1.bf16.msra.mxu1 %v2496_v43 }
 0x1a5   :  { %2145 = vmatprep.subr.bf16.mxu0 %v2499_v14  ;;  %2167 = vmatprep.subr.bf16.mxu1 %v2500_v45 }
 0x1a7   :  { %1467 = vmatmul.mubr.bf16.vlgmr.msra.gmra.mrb[4].mxu0 %v601_v48  ;;  %1549 = vmatmul.mubr.bf16.vlgmr.msra.gmra.mrb[4].mxu1 %v601_v48 }
 0x1a8   :  { %2146 = vmatpush3.bf16.msra.mxu0 %v2501_v46  ;;  %2168 = vmatpush3.bf16.msra.mxu1 %v2502_v47 }
 0x1a9   :  { %2147 = vmatprep.subr.bf16.mxu0 %v2503_v49  ;;  %2169 = vmatprep.subr.bf16.mxu1 %v2504_v50 }
 0x1ac   :  { %2148 = vmatpush3.bf16.msra.mxu0 %v2505_v51  ;;  %2170 = vmatpush3.bf16.msra.mxu1 %v2506_v52 }
 0x1ad   :  { %2149 = vmatprep.subr.bf16.mxu0 %v2507_v53  ;;  %2171 = vmatprep.subr.bf16.mxu1 %v2508_v54 }
 0x1b0   :  { %2150 = vmatpush3.bf16.msra.mxu0 %v2509_v55  ;;  %2172 = vmatpush3.bf16.msra.mxu1 %v2510_v56 }
 0x1b1   :  { %2151 = vmatprep.subr.bf16.mxu0 %v2511_v57  ;;  %2173 = vmatprep.subr.bf16.mxu1 %v2512_v58 }
 0x1b4   :  { %2152 = vmatpush3.bf16.msra.mxu0 %v2513_v59  ;;  %2174 = vmatpush3.bf16.msra.mxu1 %v2514_v60 }
 0x1b5   :  { %2153 = vmatprep.subr.bf16.mxu0 %v2515_v61  ;;  %2175 = vmatprep.subr.bf16.mxu1 %v2516_v62 }
 0x1b8   :  { %2154 = vmatpush3.bf16.msra.mxu0 %v2517_v63  ;;  %2176 = vmatpush3.bf16.msra.mxu1 %v2518_v0 }
 0x1b9   :  { %2155 = vmatprep.subr.bf16.mxu0 %v2519_v1  ;;  %2177 = vmatprep.subr.bf16.mxu1 %v2520_v2 }
 0x1bc   :  { %2156 = vmatpush3.bf16.msra.mxu0 %v2521_v3  ;;  %2178 = vmatpush3.bf16.msra.mxu1 %v2522_v4 }
 0x1bd   :  { %2157 = vmatprep.subr.bf16.mxu0 %v2523_v5  ;;  %2179 = vmatprep.subr.bf16.mxu1 %v2524_v6 }
 0x1c0   :  { %2158 = vmatpush3.bf16.msra.mxu0 %v2525_v7  ;;  %2180 = vmatpush3.bf16.msra.mxu1 %v2526_v8 }
 0x1c1   :  { %2159 = vmatprep.subr.bf16.mxu0 %v2527_v9  ;;  %2181 = vmatprep.subr.bf16.mxu1 %v2528_v10 }
 0x1c4   :  { %2160 = vmatpush3.bf16.msra.mxu0 %v2529_v11  ;;  %2182 = vmatpush3.bf16.msra.mxu1 %v2530_v12 }
 0x27a   :  { %v1468_v22 = vpop.f32.mrb[4].mxu0  ;;  %v1550_v23 = vpop.f32.mrb[4].mxu1 }
 0x27b   :  { %v2189_v24 = vadd.f32 %v1468_v22, %v1376_v18  ;;  %v2191_v25 = vadd.f32 %v1550_v23, %v1384_v19  ;;  %v1470_v26 = vpop.f32.mrb[5].mxu0  ;;  %v1552_v27 = vpop.f32.mrb[5].mxu1 }
 0x27c   :  { %v2190_v29 = vadd.f32 %v1470_v26, %v1380_v20  ;;  %v2192_v30 = vadd.f32 %v1552_v27, %v1388_v21  ;;  %v1472_v31 = vpop.f32.mrb[6].mxu0  ;;  %v1554_v32 = vpop.f32.mrb[6].mxu1 }
 0x27d   :  { %v1557_v13 = vmax.f32 %v2189_v24, 0.0  ;;  %v1559_v33 = vmax.f32 %v2191_v25, 0.0  ;;  %v1473_v34 = vpop.f32.mrb[7].mxu0  ;;  %v1555_v28 = vpop.f32.mrb[7].mxu1 }
 0x27e   :  { %v1558_v35 = vmax.f32 %v2190_v29, 0.0  ;;  %v1560_v36 = vmax.f32 %v2192_v30, 0.0 }
 0x27f   :  { %v1561_v15 = vpack.c.bf16 %v1557_v13, %v1557_v13  ;;  %v1563_v41 = vpack.c.bf16 %v1559_v33, %v1559_v33 }
 0x280   :  { %v1562_v16 = vpack.c.bf16 %v1558_v35, %v1558_v35  ;;  %v1564_v37 = vpack.c.bf16 %v1560_v36, %v1560_v36 }
 0x282   :  { %1854 = vmatprep.mubr.bf16.mxu0 %v1562_v16  ;;  %1894 = vmatprep.mubr.bf16.mxu1 %v1564_v37 }
 0x283   :  { %1855 = vmatmul.mubr.bf16.vlgmr.msra.gmra.mrb[8].mxu0 %v1561_v15  ;;  %1895 = vmatmul.mubr.bf16.vlgmr.msra.gmra.mrb[8].mxu1 %v1563_v41 }
 0x356   :  { %v2161_v38 = vpop.f32.mrb[8].mxu0  ;;  %v2183_v39 = vpop.f32.mrb[8].mxu1 }
 0x357   :  { %v2162_v42 = vpop.f32.mrb[9].mxu0  ;;  %v2184_v43 = vpop.f32.mrb[9].mxu1 }
 0x358   :  { %v2163_v44 = vadd.f32 %v2162_v42, %v2161_v38  ;;  %v2185_v14 = vadd.f32 %v2184_v43, %v2183_v39  ;;  %v2164_v45 = vpop.f32.mrb[10].mxu0  ;;  %v2186_v46 = vpop.f32.mrb[10].mxu1 }
 0x359   :  { %v2165_v47 = vpop.f32.mrb[11].mxu0  ;;  %v2187_v48 = vpop.f32.mrb[11].mxu1 }
 0x35a   :  { %v1857_v49 = vadd.f32 %v2163_v44, %v1629_v40 }
 0x35c   :  { %v1897_v50 = vadd.f32 %v2185_v14, %v1857_v49 }
 0x35e   :  { %1902 = vst [vmem:[#allocation10] sm:$0x1] %v1897_v50 }
 0x35f   :  { %2630 = shalt.err (!%p2627_p8)
}
 0x360   :  { %s2631_s13 = scalar_lea.hbm %s2822_s7, 16 }
 0x361   :  { %p2632_p9 = scmp.ne.s32.totalorder %s2822_s7, %s2631_s13  ;;  %p2635_p10 = scmp.lt.u32.totalorder %s2631_s13, %s2822_s7 }
 0x363   :  { %p2637_p11 = pnand %p2635_p10, %p2632_p9 }
 0x365   :  { %2640 = shalt.err (!%p2637_p11)
}
 0x366   :  { %1912 = dma.vmem_to_hbm [thread:$0]  %s1910_s30, 16, %s2822_s7, [#allocation4]  }
 0x367   :  { %2647 = dma.done.wait [#allocation4], 16  }
 0x368   :  { %2648 = vsyncadd [#allocation4], 4294967280 }
 0x369   :  { %1916 = vsyncpa [#allocation3], 1 }
 0x36a   :  { %1917 = vsyncpa [#allocation6], 1 }
 0x36b   :  { %1918 = vsyncpa [#allocation9], 1 }
 0x36c   :  { %1919 = vsyncpa [#allocation4], 1 }

</bundles_post_ra>
